<compile_context>
chip_gen: v5e
topology: v5e:2x2
jax: 0.10.0
libtpu: 0.0.40
codegen_flags: <defaults>
</compile_context>

<pallas_src>
import jax
import jax.numpy as jnp
from jax.experimental import pallas as pl
from jax.experimental.pallas import tpu as pltpu


def _make_cutouts_kernel(facs_ref, xw_ref, noise_ref, o_ref):
    """Single invocation: pooled = (avg + max)/2 once, then out[n] = pooled + facs[n]*noise[n]."""
    num_taps = xw_ref.shape[0]                       # static
    xw = xw_ref[...]                                 # (K, N)  all pooling-window taps
    s = jnp.sum(xw, axis=0, keepdims=True)           # (1, N)  sum over taps (sublane reduce)
    m = jnp.max(xw, axis=0, keepdims=True)           # (1, N)  max over taps
    pooled = (s * (1.0 / num_taps) + m) * 0.5        # (avg_pool + max_pool) / 2
    # Broadcast pooled over cutouts and fuse the noise add in one vector op:
    #   (1, N) + (cutn, 1) * (cutn, N)  ->  (cutn, N)   (lane-dense full-block store)
    o_ref[...] = pooled + facs_ref[...] * noise_ref[...]


def make_cutouts_pallas(x, noise, facs, cut_size, cutn):
    """x: (1, C, H, W) float32; noise: (cutn, C, cs, cs); facs: (cutn,)."""
    B, C, H, W = x.shape
    assert B == 1, "original module is used with a single image (facs broadcast)"
    cs = cut_size
    assert H % cs == 0 and W % cs == 0
    kh, kw = H // cs, W // cs
    K = kh * kw
    N = C * cs * cs

    # Layout plumbing (plain-JAX glue): window-tap axes (i, j) to the front,
    # per-tap image flattened to one lane-dense row of length N = C*cs*cs.
    # (C, oh*kh+i, ow*kw+j) -> (i, j, C, oh, ow) -> (K, N)
    xw = (x.reshape(C, cs, kh, cs, kw)
           .transpose(2, 4, 0, 1, 3)
           .reshape(K, N))
    noise_r = noise.reshape(cutn, N)
    facs_r = facs.reshape(cutn, 1).astype(x.dtype)

    out = pl.pallas_call(
        _make_cutouts_kernel,
        out_shape=jax.ShapeDtypeStruct((cutn, N), x.dtype),
        in_specs=[
            pl.BlockSpec(memory_space=pltpu.MemorySpace.VMEM),  # facs  (cutn, 1)
            pl.BlockSpec(memory_space=pltpu.MemorySpace.VMEM),  # xw    (K, N)
            pl.BlockSpec(memory_space=pltpu.MemorySpace.VMEM),  # noise (cutn, N)
        ],
        out_specs=pl.BlockSpec(memory_space=pltpu.MemorySpace.VMEM),
        compiler_params=pltpu.CompilerParams(vmem_limit_bytes=64 << 20),
    )(facs_r, xw, noise_r)

    return out.reshape(cutn, C, cs, cs)


def make_cutouts_reference(x, noise, facs, cut_size, cutn):
    """Pure-JAX reference mirroring the torch forward (augs == identity)."""
    B, C, H, W = x.shape
    kh, kw = H // cut_size, W // cut_size
    xr = x.reshape(B, C, cut_size, kh, cut_size, kw)
    avg = xr.mean(axis=(3, 5))
    mx = xr.max(axis=(3, 5))
    pooled = (avg + mx) / 2.0
    batch = jnp.concatenate([pooled] * cutn, axis=0)
    return batch + facs.reshape(cutn, 1, 1, 1) * noise


if __name__ == "__main__":
    cut_size, cutn, noise_fac = 8, 4, 0.1
    C, H, W = 3, 16, 16

    key = jax.random.PRNGKey(0)
    k_x, k_f, k_n = jax.random.split(key, 3)
    x = jax.random.uniform(k_x, (1, C, H, W), jnp.float32)
    # torch: facs = uniform_(0, noise_fac) of shape [cutn,1,1,1]; randn_like(batch)
    facs = jax.random.uniform(k_f, (cutn,), jnp.float32, minval=0.0, maxval=noise_fac)
    noise = jax.random.normal(k_n, (cutn, C, cut_size, cut_size), jnp.float32)

    out = make_cutouts_pallas(x, noise, facs, cut_size, cutn)
    out = jax.block_until_ready(out)

    ref = make_cutouts_reference(x, noise, facs, cut_size, cutn)
    assert out.shape == (cutn, C, cut_size, cut_size)
    assert jnp.allclose(out, ref, rtol=1e-5, atol=1e-5), "mismatch vs reference"

    print("KERNEL_OK")
</pallas_src>

<mosaic_0001>
module attributes {stable_mosaic.version = 11 : i64} {
  func.func @_make_cutouts_kernel(%arg0: memref<4x1xf32, #tpu.memory_space<vmem>>, %arg1: memref<4x192xf32, #tpu.memory_space<vmem>>, %arg2: memref<4x192xf32, #tpu.memory_space<vmem>>, %arg3: memref<4x192xf32, #tpu.memory_space<vmem>>) attributes {dimension_semantics = [], scalar_prefetch = 0 : i64, scratch_operands = 0 : i64, tpu.core_type = #tpu.core_type<tc>} {
    %c0 = arith.constant 0 : index
    %c0_0 = arith.constant 0 : index
    %0 = vector.load %arg1[%c0, %c0_0] : memref<4x192xf32, #tpu.memory_space<vmem>>, vector<4x192xf32>
    %cst = arith.constant dense<0.000000e+00> : vector<192xf32>
    %1 = vector.multi_reduction <add>, %0, %cst [0] : vector<4x192xf32> to vector<192xf32>
    %2 = vector.shape_cast %1 : vector<192xf32> to vector<1x192xf32>
    %cst_1 = arith.constant dense<0xFF800000> : vector<192xf32>
    %3 = vector.multi_reduction <maximumf>, %0, %cst_1 [0] : vector<4x192xf32> to vector<192xf32>
    %4 = vector.shape_cast %3 : vector<192xf32> to vector<1x192xf32>
    %cst_2 = arith.constant 2.500000e-01 : f32
    %5 = vector.broadcast %cst_2 : f32 to vector<1x192xf32>
    %6 = arith.mulf %2, %5 : vector<1x192xf32>
    %7 = arith.addf %6, %4 : vector<1x192xf32>
    %cst_3 = arith.constant 5.000000e-01 : f32
    %8 = vector.broadcast %cst_3 : f32 to vector<1x192xf32>
    %9 = arith.mulf %7, %8 : vector<1x192xf32>
    %c0_4 = arith.constant 0 : index
    %c0_5 = arith.constant 0 : index
    %10 = vector.load %arg0[%c0_4, %c0_5] : memref<4x1xf32, #tpu.memory_space<vmem>>, vector<4x1xf32>
    %c0_6 = arith.constant 0 : index
    %c0_7 = arith.constant 0 : index
    %11 = vector.load %arg2[%c0_6, %c0_7] : memref<4x192xf32, #tpu.memory_space<vmem>>, vector<4x192xf32>
    %12 = vector.broadcast %10 : vector<4x1xf32> to vector<4x192xf32>
    %13 = arith.mulf %12, %11 : vector<4x192xf32>
    %14 = vector.broadcast %9 : vector<1x192xf32> to vector<4x192xf32>
    %15 = arith.addf %14, %13 : vector<4x192xf32>
    %c0_8 = arith.constant 0 : index
    %c0_9 = arith.constant 0 : index
    %16 = vector.load %arg3[%c0_8, %c0_9] : memref<4x192xf32, #tpu.memory_space<vmem>>, vector<4x192xf32>
    tpu.vector_store %arg3[%c0_8, %c0_9], %15 {strides = array<i32>} : memref<4x192xf32, #tpu.memory_space<vmem>>, vector<4x192xf32>,
    return
  }
}

</mosaic_0001>

<bundles_post_ra>
// kernel: tpu_custom_call.1
= control target key start
LH: loop header
LB: loop body
LE: loop exit
PB: predicated region body
PF: predicated region fallthrough
CT: control target
= control target key end

     0   :  { %8 = vsyncpa [#allocation3], 0  ;;  %s257_s0 = inlined_call_operand.vmem [shape: f32[4,1], index: 0, kind: input, shape index: {}]   ;;  %s258_s1 = inlined_call_operand.hbm [shape: f32[4,192], index: 1, kind: input, shape index: {}]   ;;  %s259_s2 = inlined_call_operand.hbm [shape: f32[4,192], index: 2, kind: input, shape index: {}]   ;;  %s260_s3 = inlined_call_operand.hbm [shape: f32[4,192], index: 3, kind: output, shape index: {}]  }
   0x1   :  { %9 = vsyncpa [#allocation6], 0 }
   0x2   :  { %10 = vsyncpa [#allocation4], 0  ;;  %s18_s14 = sshll.u32 %s258_s1, 4  ;;  %s217_s15 = smov [#allocation2]   ;;  %s19_s14 = int_to_ptr.hbm [resolvable:$true] %s18_s14 }
   0x3   :  { %s20_s16 = sshll.u32 %s217_s15, 4  ;;  %s29_s19 = sshll.u32 %s259_s2, 4  ;;  %s21_s16 = int_to_ptr.vmem [resolvable:$true] %s20_s16  ;;  %s30_s19 = int_to_ptr.hbm [resolvable:$true] %s29_s19 }
   0x4   :  { %23 = dma.hbm_to_vmem [thread:$0]  %s19_s14, 128, %s21_s16, [#allocation3]  }
   0x5   :  { %s218_s20 = smov [#allocation5]  }
   0x6   :  { %s31_s21 = sshll.u32 %s218_s20, 4  ;;  %s32_s21 = int_to_ptr.vmem [resolvable:$true] %s31_s21 }
   0x7   :  { %34 = dma.hbm_to_vmem [thread:$0]  %s30_s19, 128, %s32_s21, [#allocation6]  }
   0x8   :  { %211 = dma.done.wait [#allocation3], 128  }
   0x9   :  { %212 = vsyncadd [#allocation3], 4294967168 }
   0xa   :  { %213 = dma.done.wait [#allocation6], 128  }
   0xb   :  { %214 = vsyncadd [#allocation6], 4294967168  ;;  %v219_v0 = vmov 0   ;;  %v91_v1 = vld [vmem:[%s257_s0] sm:$0xf]  ;;  %v43_v2 = vld [vmem:[#allocation2] sm:$0xff] }
   0xc   :  { %138 = vset.pattern.permute.xlu0 %v219_v0  ;;  %45 = vst [vmem:[#allocation1] ss:$2 sm:$0xff] %v43_v2  ;;  %v92_v5 = vld [vmem:[#allocation5] sm:$0xff]  ;;  %vm58_vm0 = vcmask 519168   ;;  %vm50_vm1 = vcmask 1043456   ;;  %vm113_vm2 = vcmask 523268  }
   0xd   :  { %95 = vperm.xlu0 %138, %v91_v1   ;;  %s220_s0 = smov [#allocation7]   ;;  %s123_s25 = sshll.u32 %s260_s3, 4  ;;  %vm114_vm3 = vmor %vm113_vm2, %vm50_vm1  ;;  %s124_s25 = int_to_ptr.hbm [resolvable:$true] %s123_s25 }
   0xe   :  { %s121_s2 = sshll.u32 %s220_s0, 4  ;;  %s122_s2 = int_to_ptr.vmem [resolvable:$true] %s121_s2 }
  0x13   :  { %v46_v3 = vld.sshfl [vmem:[#allocation1] sm:$0xff pattern:$0x75316420]  ;;  %v47_v4 = vld.sshfl [vmem:[#allocation1 + $0x8] sm:$0xff pattern:$0x75316420] }
  0x14   :  { %66 = vst [vmem:[#allocation1] ss:$2 sm:$0xff] %v43_v2  ;;  %v59_v8 = vsel %vm58_vm0, %v47_v4, 0.0  ;;  %v51_v9 = vsel %vm50_vm1, %v46_v3, 0.0 }
  0x15   :  { %v60_v10 = vrot.slane %v59_v8, 4  ;;  %v52_v12 = vrot.slane %v51_v9, 4 }
  0x17   :  { %v61_v14 = vadd.f32 %v60_v10, %v59_v8  ;;  %v53_v16 = vadd.f32 %v52_v12, %v51_v9 }
  0x19   :  { %v62_v18 = vrot.slane %v61_v14, 2  ;;  %v54_v20 = vrot.slane %v53_v16, 2 }
  0x1b   :  { %v67_v6 = vld.sshfl [vmem:[#allocation1] sm:$0xff pattern:$0x75316420]  ;;  %v68_v7 = vld.sshfl [vmem:[#allocation1 + $0x8] sm:$0xff pattern:$0x75316420]  ;;  %v63_v22 = vadd.f32 %v62_v18, %v61_v14  ;;  %v55_v24 = vadd.f32 %v54_v20, %v53_v16 }
  0x1c   :  { %99 = vst [vmem:[#allocation1] ss:$2 sm:$0xff] %v92_v5  ;;  %v78_v11 = vsel %vm58_vm0, %v68_v7, -inf  ;;  %v71_v13 = vsel %vm50_vm1, %v67_v6, -inf }
  0x1d   :  { %v79_v15 = vrot.slane %v78_v11, 4  ;;  %v72_v17 = vrot.slane %v71_v13, 4  ;;  %v64_v26 = vrot.slane %v63_v22, 1  ;;  %v56_v28 = vrot.slane %v55_v24, 1 }
  0x1f   :  { %v80_v19 = vmax.f32 %v78_v11, %v79_v15  ;;  %v73_v21 = vmax.f32 %v71_v13, %v72_v17  ;;  %v65_v30 = vadd.f32 %v64_v26, %v63_v22  ;;  %v57_v32 = vadd.f32 %v56_v28, %v55_v24 }
  0x21   :  { %v81_v23 = vrot.slane %v80_v19, 2  ;;  %v74_v25 = vrot.slane %v73_v21, 2  ;;  %v86_v35 = vmul.f32 0.25, %v65_v30  ;;  %v85_v37 = vmul.f32 0.25, %v57_v32 }
  0x23   :  { %v82_v27 = vmax.f32 %v80_v19, %v81_v23  ;;  %v75_v29 = vmax.f32 %v73_v21, %v74_v25  ;;  %v100_v40 = vld.sshfl [vmem:[#allocation1] sm:$0xff pattern:$0x75316420]  ;;  %v101_v41 = vld.sshfl [vmem:[#allocation1 + $0x8] sm:$0xff pattern:$0x75316420] }
  0x25   :  { %v83_v31 = vrot.slane %v82_v27, 1  ;;  %v76_v33 = vrot.slane %v75_v29, 1 }
  0x27   :  { %v84_v34 = vmax.f32 %v82_v27, %v83_v31  ;;  %v77_v36 = vmax.f32 %v75_v29, %v76_v33 }
  0x29   :  { %v88_v38 = vadd.f32 %v86_v35, %v84_v34  ;;  %v87_v39 = vadd.f32 %v85_v37, %v77_v36 }
  0x2b   :  { %v90_v42 = vmul.f32 0.5, %v88_v38  ;;  %v89_v44 = vmul.f32 0.5, %v87_v39 }
  0x7f   :  { %v96_v43 = vpop.permute.xlu0 %95 }
  0x80   :  { %v104_v45 = vmul.f32 %v100_v40, %v96_v43  ;;  %v105_v46 = vmul.f32 %v101_v41, %v96_v43 }
  0x82   :  { %v107_v47 = vadd.f32 %v105_v46, %v90_v42  ;;  %v106_v48 = vadd.f32 %v104_v45, %v89_v44 }
  0x84   :  { %v110_v49 = vrot.slane %v107_v47, 4 }
  0x86   :  { %v111_v50 = vsel %vm50_vm1, %v106_v48, %v110_v49 }
  0x87   :  { %115 = vst.msk [vmem:[#allocation7] sm:$0xff] %vm114_vm3, %v111_v50 }
  0x88   :  { %126 = dma.vmem_to_hbm [thread:$0]  %s122_s2, 128, %s124_s25, [#allocation4]  }
  0x89   :  { %215 = dma.done.wait [#allocation4], 128  }
  0x8a   :  { %216 = vsyncadd [#allocation4], 4294967168 }
  0x8b   :  { %131 = vsyncpa [#allocation3], 1 }
  0x8c   :  { %132 = vsyncpa [#allocation6], 1 }
  0x8d   :  { %133 = vsyncpa [#allocation4], 1 }

</bundles_post_ra>
